<compile_context>
chip_gen: v6e
topology: v6e:2x2x1
jax: 0.10.0
libtpu: 0.0.40
codegen_flags: <defaults>
</compile_context>

<pallas_src>
import jax
import jax.numpy as jnp
from jax.experimental import pallas as pl
from jax.experimental.pallas import tpu as pltpu

_EPS = 1e-5


def _layernorm_kernel(x_ref, w_ref, b_ref, o_ref):
    # x_ref: (TILE_ROWS, H) tile; w_ref/b_ref: (1, H) resident params.
    x = x_ref[...].astype(jnp.float32)
    mean = jnp.mean(x, axis=-1, keepdims=True)
    xc = x - mean
    var = jnp.mean(xc * xc, axis=-1, keepdims=True)
    inv = jax.lax.rsqrt(var + _EPS)
    w = w_ref[...].astype(jnp.float32)
    b = b_ref[...].astype(jnp.float32)
    o_ref[...] = (xc * inv * w + b).astype(o_ref.dtype)


def _chip_info():
    """Return (vmem_capacity_bytes, num_tensorcores) with safe fallbacks."""
    vmem_cap = 64 * 1024 * 1024  # conservative fallback: v7x per-TC VMEM
    try:
        vmem_cap = int(pltpu.get_tpu_info().vmem_capacity_bytes)
    except Exception:
        pass
    # v7x exposes 64 MiB VMEM per TensorCore and has 2 TCs/chip; v5e/v6e expose
    # 128 MiB and a single TC.  Infer from capacity (best-effort heuristic).
    num_tc = 2 if vmem_cap <= 64 * 1024 * 1024 else 1
    return vmem_cap, num_tc


def _sublane_granule(dtype):
    itemsize = jnp.dtype(dtype).itemsize
    # 8 sublanes for 32-bit, 16 for bf16/fp16, 32 for int8/fp8.
    return max(8, 32 // max(itemsize, 1))


def _pick_tile_rows(R, H, dtype, vmem_cap, num_tc):
    """Row tile sized by HBM traffic per step, clamped by a VMEM budget that
    includes the f32 compute intermediates, with a minimum pipeline depth."""
    sublane = _sublane_granule(dtype)
    itemsize = jnp.dtype(dtype).itemsize

    # Per-row VMEM footprint:
    #   double-buffered input + output tiles        : 2 * (in + out) * H
    #   ~3 f32 intermediates (x, xc, scaled product): 3 * 4 * H
    vmem_per_row = 2 * (itemsize + itemsize) * H + 3 * 4 * H
    # Modest budget (~25% of capacity) — big tiles buy nothing once the DMA per
    # step dwarfs the ~0.35 us step overhead (true at ~8 MiB/step even on v5e).
    vmem_budget = int(vmem_cap * 0.25)
    max_rows_vmem = max(sublane, vmem_budget // max(vmem_per_row, 1))

    # Target ~8 MiB of (in + out) HBM traffic per grid step.
    traffic_target = 8 * 1024 * 1024
    rows_traffic = max(sublane, traffic_target // max(2 * H * itemsize, 1))

    tile = min(max_rows_vmem, rows_traffic)

    # Minimum pipeline depth: keep >= min_steps grid steps where R allows, so
    # the auto double-buffering actually overlaps DMA with compute and (on
    # multi-TC chips) both cores get several steps each.
    min_steps = 8 if num_tc >= 2 else 4
    if R > sublane * min_steps:
        tile = min(tile, max(sublane, R // min_steps))

    # Sublane-align (rounding down keeps us inside the budget).
    tile = max(sublane, (tile // sublane) * sublane)

    # Never exceed the (sublane-padded) total row count.
    r_pad = ((R + sublane - 1) // sublane) * sublane
    tile = min(tile, r_pad)

    # Best-effort: on multi-TC chips make the number of grid steps a multiple
    # of the TC count so the 'parallel' axis shards evenly.
    if num_tc >= 2:
        num_tiles = -(-R // tile)
        if num_tiles > 1 and num_tiles % num_tc != 0:
            target = ((num_tiles + num_tc - 1) // num_tc) * num_tc
            tile = -(-R // target)
            tile = max(sublane, (tile // sublane) * sublane)
            tile = min(tile, r_pad)
    return tile


def layer_norm_pallas(x, weight, bias=None, *, tile_rows=None):
    """LayerNorm over the last dim of x (any leading dims), eps=1e-5.

    Matches PyTorch F.layer_norm(x, (H,), weight, bias, 1e-5).
    """
    orig_shape = x.shape
    H = orig_shape[-1]
    R = 1
    for d in orig_shape[:-1]:
        R *= d
    x2 = x.reshape(R, H)

    if bias is None:
        bias = jnp.zeros((H,), dtype=weight.dtype)

    w2 = weight.reshape(1, H)
    b2 = bias.reshape(1, H)

    vmem_cap, num_tc = _chip_info()
    sublane = _sublane_granule(x.dtype)
    if tile_rows is None:
        tile_rows = _pick_tile_rows(R, H, x.dtype, vmem_cap, num_tc)
    else:
        tile_rows = max(sublane, (tile_rows // sublane) * sublane)

    # Ragged last block: no wrapper-side padding.  Pallas masks the writeback
    # of the out-of-range rows of the final tile; garbage read there can only
    # produce NaN/Inf in discarded rows because all math is per-row.
    num_tiles = pl.cdiv(R, tile_rows)

    in_bytes = jnp.dtype(x.dtype).itemsize
    out_bytes = in_bytes
    param_bytes = jnp.dtype(weight.dtype).itemsize

    # VMEM needed: double-buffered in+out tiles + f32 intermediates + params.
    vmem_needed = (
        2 * tile_rows * H * (in_bytes + out_bytes)
        + 3 * tile_rows * H * 4
        + 4 * H * param_bytes
    )
    vmem_limit = int(min(vmem_cap * 0.7, max(32 * 1024 * 1024, vmem_needed * 3 // 2)))
    vmem_limit = max(vmem_limit, vmem_needed)

    cost = pl.CostEstimate(
        flops=9 * R * H,
        transcendentals=R,  # one rsqrt per row
        bytes_accessed=R * H * (in_bytes + out_bytes) + 2 * H * param_bytes,
    )

    out = pl.pallas_call(
        _layernorm_kernel,
        out_shape=jax.ShapeDtypeStruct((R, H), x.dtype),
        grid_spec=pltpu.PrefetchScalarGridSpec(
            num_scalar_prefetch=0,
            grid=(num_tiles,),
            in_specs=[
                pl.BlockSpec((tile_rows, H), lambda i: (i, 0)),
                pl.BlockSpec((1, H), lambda i: (0, 0)),
                pl.BlockSpec((1, H), lambda i: (0, 0)),
            ],
            out_specs=pl.BlockSpec((tile_rows, H), lambda i: (i, 0)),
        ),
        compiler_params=pltpu.CompilerParams(
            dimension_semantics=("parallel",),
            vmem_limit_bytes=vmem_limit,
        ),
        cost_estimate=cost,
    )(x2, w2, b2)

    return out.reshape(orig_shape)


def _ref_layernorm(x, w, b):
    mean = jnp.mean(x, axis=-1, keepdims=True)
    var = jnp.mean((x - mean) ** 2, axis=-1, keepdims=True)
    return (x - mean) / jnp.sqrt(var + _EPS) * w + b


if __name__ == "__main__":
    # Module shapes: LayerNorm(ndim=H, bias=True) applied to (B, T, H).
    B, T, H = 2, 8, 32
    key = jax.random.PRNGKey(0)
    x = jax.random.normal(key, (B, T, H), dtype=jnp.float32)

    # Deterministic parameter init matching nn.Parameter(torch.ones/zeros(ndim)).
    weight = jnp.ones((H,), dtype=jnp.float32)
    bias = jnp.zeros((H,), dtype=jnp.float32)

    y = layer_norm_pallas(x, weight, bias)
    jax.block_until_ready(y)
    assert jnp.allclose(y, _ref_layernorm(x, weight, bias), atol=1e-5, rtol=1e-5), \
        "mismatch vs reference"

    # Exercise the ragged-last-block path (R = 111 rows, not a tile multiple,
    # multiple grid steps) to validate no-pad handling.
    B2, T2, H2 = 3, 37, 256
    x2 = jax.random.normal(jax.random.PRNGKey(1), (B2, T2, H2), dtype=jnp.float32)
    w2 = jnp.ones((H2,), dtype=jnp.float32)
    b2 = jnp.zeros((H2,), dtype=jnp.float32)
    y2 = layer_norm_pallas(x2, w2, b2, tile_rows=24)  # forces a partial last tile
    jax.block_until_ready(y2)
    assert jnp.allclose(y2, _ref_layernorm(x2, w2, b2), atol=1e-5, rtol=1e-5), \
        "mismatch vs reference (ragged path)"

    print("KERNEL_OK")
</pallas_src>

<mosaic_0001>
module attributes {stable_mosaic.version = 11 : i64} {
  func.func @_layernorm_kernel(%arg0: i32, %arg1: memref<16x32xf32, #tpu.memory_space<vmem>>, %arg2: memref<1x32xf32, #tpu.memory_space<vmem>>, %arg3: memref<1x32xf32, #tpu.memory_space<vmem>>, %arg4: memref<16x32xf32, #tpu.memory_space<vmem>>) attributes {dimension_semantics = [#tpu.dimension_semantics<parallel>], iteration_bounds = array<i64: 1>, scalar_prefetch = 0 : i64, scratch_operands = 0 : i64, tpu.core_type = #tpu.core_type<tc>, window_params = [{transform_indices = @transform_0, window_bounds = array<i64: 16, 32>}, {pipeline_mode = #tpu.pipeline_mode<synchronous>, transform_indices = @transform_1, window_bounds = array<i64: 1, 32>}, {pipeline_mode = #tpu.pipeline_mode<synchronous>, transform_indices = @transform_2, window_bounds = array<i64: 1, 32>}, {transform_indices = @transform_3, window_bounds = array<i64: 16, 32>}]} {
    %c0 = arith.constant 0 : index
    %c0_0 = arith.constant 0 : index
    %0 = vector.load %arg1[%c0, %c0_0] : memref<16x32xf32, #tpu.memory_space<vmem>>, vector<16x32xf32>
    %cst = arith.constant dense<0.000000e+00> : vector<16xf32>
    %1 = vector.multi_reduction <add>, %0, %cst [1] : vector<16x32xf32> to vector<16xf32>
    %2 = vector.shape_cast %1 : vector<16xf32> to vector<16x1xf32>
    %cst_1 = arith.constant 3.200000e+01 : f32
    %3 = vector.broadcast %cst_1 : f32 to vector<16x1xf32>
    %4 = arith.divf %2, %3 : vector<16x1xf32>
    %5 = vector.broadcast %4 : vector<16x1xf32> to vector<16x32xf32>
    %6 = arith.subf %0, %5 : vector<16x32xf32>
    %7 = arith.mulf %6, %6 : vector<16x32xf32>
    %cst_2 = arith.constant dense<0.000000e+00> : vector<16xf32>
    %8 = vector.multi_reduction <add>, %7, %cst_2 [1] : vector<16x32xf32> to vector<16xf32>
    %9 = vector.shape_cast %8 : vector<16xf32> to vector<16x1xf32>
    %cst_3 = arith.constant 3.200000e+01 : f32
    %10 = vector.broadcast %cst_3 : f32 to vector<16x1xf32>
    %11 = arith.divf %9, %10 : vector<16x1xf32>
    %cst_4 = arith.constant 9.99999974E-6 : f32
    %12 = vector.broadcast %cst_4 : f32 to vector<16x1xf32>
    %13 = arith.addf %11, %12 : vector<16x1xf32>
    %14 = math.rsqrt %13 : vector<16x1xf32>
    %c0_5 = arith.constant 0 : index
    %c0_6 = arith.constant 0 : index
    %15 = vector.load %arg2[%c0_5, %c0_6] : memref<1x32xf32, #tpu.memory_space<vmem>>, vector<1x32xf32>
    %c0_7 = arith.constant 0 : index
    %c0_8 = arith.constant 0 : index
    %16 = vector.load %arg3[%c0_7, %c0_8] : memref<1x32xf32, #tpu.memory_space<vmem>>, vector<1x32xf32>
    %17 = vector.broadcast %14 : vector<16x1xf32> to vector<16x32xf32>
    %18 = arith.mulf %6, %17 : vector<16x32xf32>
    %19 = vector.broadcast %15 : vector<1x32xf32> to vector<16x32xf32>
    %20 = arith.mulf %18, %19 : vector<16x32xf32>
    %21 = vector.broadcast %16 : vector<1x32xf32> to vector<16x32xf32>
    %22 = arith.addf %20, %21 : vector<16x32xf32>
    %c0_9 = arith.constant 0 : index
    %c0_10 = arith.constant 0 : index
    %23 = vector.load %arg4[%c0_9, %c0_10] : memref<16x32xf32, #tpu.memory_space<vmem>>, vector<16x32xf32>
    tpu.vector_store %arg4[%c0_9, %c0_10], %22 {strides = array<i32>} : memref<16x32xf32, #tpu.memory_space<vmem>>, vector<16x32xf32>,
    return
  }
  func.func @transform_0(%arg0: i32) -> (i32, i32) {
    %c0_i32 = arith.constant 0 : i32
    %c0_i32_0 = arith.constant 0 : i32
    return %arg0, %c0_i32 : i32, i32
  }
  func.func @transform_1(%arg0: i32) -> (i32, i32) {
    %c0_i32 = arith.constant 0 : i32
    %c0_i32_0 = arith.constant 0 : i32
    %c0_i32_1 = arith.constant 0 : i32
    return %c0_i32, %c0_i32_0 : i32, i32
  }
  func.func @transform_2(%arg0: i32) -> (i32, i32) {
    %c0_i32 = arith.constant 0 : i32
    %c0_i32_0 = arith.constant 0 : i32
    %c0_i32_1 = arith.constant 0 : i32
    return %c0_i32, %c0_i32_0 : i32, i32
  }
  func.func @transform_3(%arg0: i32) -> (i32, i32) {
    %c0_i32 = arith.constant 0 : i32
    %c0_i32_0 = arith.constant 0 : i32
    return %arg0, %c0_i32 : i32, i32
  }
}

</mosaic_0001>

<bundles_post_ra>
// kernel: tpu_custom_call.1
= control target key start
LH: loop header
LB: loop body
LE: loop exit
PB: predicated region body
PF: predicated region fallthrough
CT: control target
= control target key end

     0   :  { %8 = vsyncpa [#allocation3], 0  ;;  %s198_s0 = inlined_call_operand.hbm [shape: f32[16,32], index: 0, kind: input, shape index: {}]   ;;  %s199_s1 = inlined_call_operand.vmem [shape: f32[1,32], index: 1, kind: input, shape index: {}]   ;;  %s200_s2 = inlined_call_operand.vmem [shape: f32[1,32], index: 2, kind: input, shape index: {}]   ;;  %s201_s3 = inlined_call_operand.hbm [shape: f32[16,32], index: 3, kind: output, shape index: {}]  }
   0x1   :  { %9 = vsyncpa [#allocation4], 0  ;;  %s150_s12 = smov [#allocation2]  }
   0x2   :  { %s15_s13 = sshll.u32 %s150_s12, 4  ;;  %s16_s13 = int_to_ptr.vmem [resolvable:$true] %s15_s13 }
   0x3   :  { %s114_s14 = scalar_lea.vmem %s16_s13, 256  ;;  %p119_p1 = scmp.lt.s32.totalorder %s16_s13, %s16_s13 }
   0x4   :  { %p115_p0 = scmp.ne.s32.totalorder %s16_s13, %s114_s14  ;;  %p120_p2 = scmp.lt.s32.totalorder %s114_s14, %s114_s14 }
   0x6   :  { %p121_p3 = por %p120_p2, %p119_p1 }
   0x8   :  { %p122_p4 = pnand %p121_p3, %p115_p0 }
   0xa   :  { %125 = shalt.err (!%p122_p4)
}
   0xb   :  { %s151_s15 = smov 128   ;;  %s152_s16 = smov 8  }
   0xc   :  { %21 = dma.hbm_to_vmem [thread:$0]  %s198_s0, 256, %s16_s13, [#allocation3], %s151_s15, %s151_s15, %s152_s16  }
   0xd   :  { %146 = dma.done.wait [#allocation3], 256  }
   0xe   :  { %147 = vsyncadd [#allocation3], 4294967040  ;;  %vm31_vm0 = vcmask 261120   ;;  %v29_v0 = vld [vmem:[#allocation2] sm:$0xff]  ;;  %v30_v1 = vld [vmem:[#allocation2 + $0x8] sm:$0xff]  ;;  %s153_s22 = smov [#allocation5]  }
   0xf   :  { %v32_v2 = vsel %vm31_vm0, %v29_v0, 0.0  ;;  %v35_v3 = vsel %vm31_vm0, %v30_v1, 0.0  ;;  %v96_v21 = vld [vmem:[%s199_s1] ss:$0 sm:$0xff]  ;;  %s84_s23 = sshll.u32 %s153_s22, 4  ;;  %s85_s23 = int_to_ptr.vmem [resolvable:$true] %s84_s23 }
  0x10   :  { %33 = vadd.xlane.f32.xlu0 %v32_v2  ;;  %v97_v23 = vld [vmem:[%s200_s2] ss:$0 sm:$0xff]  ;;  %s126_s24 = scalar_lea.vmem %s85_s23, 256  ;;  %p131_p6 = scmp.lt.s32.totalorder %s85_s23, %s85_s23 }
  0x11   :  { %p127_p5 = scmp.ne.s32.totalorder %s85_s23, %s126_s24  ;;  %p132_p7 = scmp.lt.s32.totalorder %s126_s24, %s126_s24 }
  0x13   :  { %p133_p8 = por %p132_p7, %p131_p6 }
  0x14   :  { %36 = vadd.xlane.f32.xlu0 %v35_v3 }
  0x15   :  { %p134_p9 = pnand %p133_p8, %p127_p5 }
  0x99   :  { %v34_v4 = vpop.xlane.xlu0 %33 }
  0x9a   :  { %v39_v5 = vmul.f32 0.03125, %v34_v4 }
  0x9c   :  { %v41_v6 = vsub.f32 %v29_v0, %v39_v5 }
  0x9d   :  { %v37_v7 = vpop.xlane.xlu0 %36 }
  0x9e   :  { %v40_v8 = vmul.f32 0.03125, %v37_v7  ;;  %v43_v9 = vmul.f32 %v41_v6, %v41_v6 }
  0xa0   :  { %v42_v10 = vsub.f32 %v30_v1, %v40_v8  ;;  %v45_v11 = vsel %vm31_vm0, %v43_v9, 0.0 }
  0xa1   :  { %46 = vadd.xlane.f32.xlu1 %v45_v11 }
  0xa2   :  { %v44_v12 = vmul.f32 %v42_v10, %v42_v10 }
  0xa4   :  { %v48_v13 = vsel %vm31_vm0, %v44_v12, 0.0 }
  0xa5   :  { %49 = vadd.xlane.f32.xlu1 %v48_v13 }
 0x12a   :  { %v47_v14 = vpop.xlane.xlu1 %46 }
 0x12b   :  { %v51_v15 = vmul.f32 0.03125, %v47_v14 }
 0x12d   :  { %v53_v16 = vadd.f32 1e-05, %v51_v15 }
 0x12e   :  { %v50_v17 = vpop.xlane.xlu1 %49 }
 0x12f   :  { %102 = vrsqrt.f32 %v53_v16  ;;  %v52_v18 = vmul.f32 0.03125, %v50_v17 }
 0x131   :  { %v54_v19 = vadd.f32 1e-05, %v52_v18 }
 0x133   :  { %104 = vrsqrt.f32 %v54_v19 }
 0x13c   :  { %v103_v20 = vpop.eup %102 }
 0x13d   :  { %v59_v22 = vmul.f32 %v103_v20, %v41_v6 }
 0x13f   :  { %v67_v24 = vmul.f32 %v96_v21, %v59_v22 }
 0x140   :  { %v105_v25 = vpop.eup %104 }
 0x141   :  { %v60_v26 = vmul.f32 %v105_v25, %v42_v10  ;;  %v75_v27 = vadd.f32 %v97_v23, %v67_v24 }
 0x143   :  { %v68_v28 = vmul.f32 %v96_v21, %v60_v26  ;;  %77 = vst.msk [vmem:[#allocation5] sm:$0xff] %vm31_vm0, %v75_v27 }
 0x145   :  { %v76_v29 = vadd.f32 %v97_v23, %v68_v28 }
 0x147   :  { %78 = vst.msk [vmem:[#allocation5 + $0x8] sm:$0xff] %vm31_vm0, %v76_v29 }
 0x148   :  { %137 = shalt.err (!%p134_p9)
}
 0x149   :  { %90 = dma.vmem_to_hbm [thread:$0]  %s85_s23, 256, %s201_s3, [#allocation4], %s151_s15, %s151_s15, %s152_s16  }
 0x14a   :  { %148 = dma.done.wait [#allocation4], 256  }
 0x14b   :  { %149 = vsyncadd [#allocation4], 4294967040 }
 0x14c   :  { %94 = vsyncpa [#allocation3], 1 }
 0x14d   :  { %95 = vsyncpa [#allocation4], 1 }

</bundles_post_ra>
